<compile_context>
chip_gen: v6e
topology: v6e:2x2x1
jax: 0.10.0
libtpu: 0.0.40
codegen_flags: <defaults>
</compile_context>

<pallas_src>
import jax
import jax.numpy as jnp
from jax.experimental import pallas as pl
from jax.experimental.pallas import tpu as pltpu

_LANES = 128
_MAX_TILE_ROWS = 4096            # 4096 x 128 x 4 B = 2 MiB per f32 tile (1 MiB bf16)
_FAST_PATH_SLAB_BYTES = 2 << 20  # whole-slab-in-VMEM single-call threshold


def _round_up(a, b):
    return -(-a // b) * b


def _make_fused_kernel(n):
    """Single-call path: sum, mean (true count n) and subtract in one kernel."""
    def kernel(x_ref, o_ref):
        x = x_ref[...].astype(jnp.float32)
        mean = jnp.sum(x) / jnp.float32(n)          # padded zeros contribute 0
        o_ref[...] = (x - mean).astype(o_ref.dtype)
    return kernel


def _make_partial_sum_kernel(n_tiles, half):
    """Pass 1: per-core resident (8,128) accumulator of sublane-group partial sums."""
    full = (2 * half == n_tiles)  # even tile count -> no overflow step to mask

    def kernel(x_ref, acc_ref):
        @pl.when(pl.program_id(1) == 0)
        def _():
            acc_ref[...] = jnp.zeros_like(acc_ref)

        def _accumulate():
            x = x_ref[...].astype(jnp.float32)
            # (tile_r,128) -> (tile_r//8, 8, 128); leading-dim sum = pure VPU vreg adds.
            acc_ref[...] += jnp.sum(x.reshape(-1, 8, _LANES), axis=0)

        if full:
            _accumulate()
        else:
            t = pl.program_id(0) * half + pl.program_id(1)
            pl.when(t < n_tiles)(_accumulate)

    return kernel


def _make_subtract_kernel(n):
    """Pass 2: fused finalize (reduce partials, divide by true n) + tiled subtract."""
    def kernel(part_ref, x_ref, o_ref):
        # (16,128) partials reduce is ~2K elements -> negligible vs the 1-2 MiB tile.
        mean = jnp.sum(part_ref[...]) / jnp.float32(n)
        o_ref[...] = (x_ref[...].astype(jnp.float32) - mean).astype(o_ref.dtype)
    return kernel


def centered_layer(x):
    """x - x.mean() over ALL elements, any shape, float dtype preserved."""
    orig_shape = x.shape
    n = x.size
    dtype = x.dtype
    itemsize = jnp.dtype(dtype).itemsize
    sublane_align = max(8, 8 * (4 // itemsize))   # 8 (f32) / 16 (bf16) / 32 (int8/fp8)

    rows = -(-n // _LANES)                        # cdiv
    rows_al = _round_up(rows, sublane_align)
    slab_bytes = rows_al * _LANES * itemsize
    fast_path = slab_bytes <= _FAST_PATH_SLAB_BYTES

    if fast_path:
        n_tiles = 1
        tile_r = rows_al
        padded_rows = rows_al
    else:
        # tile_r ~ rows_al / n_tiles rounded to sublane alignment -> padding waste is
        # at most a few KiB while each step still moves ~1-2 MiB.
        n_tiles = -(-rows_al // _MAX_TILE_ROWS)            # >= 2 on this path
        tile_r = _round_up(-(-rows_al // n_tiles), sublane_align)
        padded_rows = tile_r * n_tiles

    x_flat = x.reshape(-1)
    pad_len = padded_rows * _LANES - n
    if pad_len:
        # TODO(synk): for large non-128-aligned inputs this pad and the final slice are
        # each an extra HBM copy; masked edge tiles would eliminate them.
        x_flat = jnp.pad(x_flat, (0, pad_len))   # zero pad: no effect on the sum
    x2d = x_flat.reshape(padded_rows, _LANES)

    if fast_path:
        # ---- one dispatch: whole slab resident in VMEM, x read from HBM once ----
        out2d = pl.pallas_call(
            _make_fused_kernel(n),
            out_shape=jax.ShapeDtypeStruct((padded_rows, _LANES), dtype),
        )(x2d)
    else:
        half = -(-n_tiles // 2)

        # ---- pass 1: core-split tiled partial-sum reduction ----
        partials = pl.pallas_call(
            _make_partial_sum_kernel(n_tiles, half),
            out_shape=jax.ShapeDtypeStruct((16, _LANES), jnp.float32),
            grid_spec=pltpu.PrefetchScalarGridSpec(
                num_scalar_prefetch=0,
                grid=(2, half),
                in_specs=[pl.BlockSpec(
                    (tile_r, _LANES),
                    lambda c, i: (jnp.minimum(c * half + i, n_tiles - 1), 0))],
                out_specs=pl.BlockSpec((8, _LANES), lambda c, i: (c, 0)),
            ),
            compiler_params=pltpu.CompilerParams(
                dimension_semantics=("parallel", "arbitrary")),
        )(x2d)

        # ---- pass 2: pipelined tiled subtract (finalize fused in-kernel) ----
        out2d = pl.pallas_call(
            _make_subtract_kernel(n),
            out_shape=jax.ShapeDtypeStruct((padded_rows, _LANES), dtype),
            grid_spec=pltpu.PrefetchScalarGridSpec(
                num_scalar_prefetch=0,
                grid=(n_tiles,),
                in_specs=[
                    pl.BlockSpec((16, _LANES), lambda i: (0, 0)),       # partials
                    pl.BlockSpec((tile_r, _LANES), lambda i: (i, 0)),   # x tile
                ],
                out_specs=pl.BlockSpec((tile_r, _LANES), lambda i: (i, 0)),
            ),
            compiler_params=pltpu.CompilerParams(
                dimension_semantics=("parallel",)),   # shard stream across TCs on v7x
        )(partials, x2d)

    return out2d.reshape(-1)[:n].reshape(orig_shape)


if __name__ == "__main__":
    key = jax.random.PRNGKey(0)

    # Small NCHW-style input consistent with a generic forward pass (fast path).
    x = jax.random.normal(key, (2, 4, 16, 16), dtype=jnp.float32)
    out = jax.block_until_ready(centered_layer(x))
    ref = x - jnp.mean(x)
    assert out.shape == x.shape and out.dtype == x.dtype
    assert jnp.allclose(out, ref, atol=1e-6, rtol=1e-6)
    assert abs(float(jnp.mean(out))) < 1e-5

    # Non-multiple-of-128 element count (padding path, still fast path).
    x2 = jax.random.normal(jax.random.PRNGKey(1), (2, 4, 9, 13), dtype=jnp.float32)
    out2 = jax.block_until_ready(centered_layer(x2))
    ref2 = x2 - jnp.mean(x2)
    assert out2.shape == x2.shape and out2.dtype == x2.dtype
    assert jnp.allclose(out2, ref2, atol=1e-6, rtol=1e-6)

    # Larger input exercising the tiled two-pass path with an ODD tile count
    # (masked overflow step on the core-split reduction grid).
    x3 = jax.random.normal(jax.random.PRNGKey(2), (18, 16, 64, 64), dtype=jnp.float32)
    out3 = jax.block_until_ready(centered_layer(x3))
    ref3 = x3 - jnp.mean(x3)
    assert out3.shape == x3.shape and out3.dtype == x3.dtype
    assert jnp.allclose(out3, ref3, atol=1e-5, rtol=1e-5)

    print("KERNEL_OK")
</pallas_src>

<mosaic_0001>
module attributes {stable_mosaic.version = 11 : i64} {
  func.func @kernel(%arg0: memref<16x128xf32, #tpu.memory_space<vmem>>, %arg1: memref<16x128xf32, #tpu.memory_space<vmem>>) attributes {dimension_semantics = [], scalar_prefetch = 0 : i64, scratch_operands = 0 : i64, tpu.core_type = #tpu.core_type<tc>} {
    %c0 = arith.constant 0 : index
    %c0_0 = arith.constant 0 : index
    %0 = vector.load %arg0[%c0, %c0_0] : memref<16x128xf32, #tpu.memory_space<vmem>>, vector<16x128xf32>
    %1 = vector.shape_cast %0 : vector<16x128xf32> to vector<1x16x128xf32>
    %cst = arith.constant dense<0.000000e+00> : vector<1xf32>
    %2 = vector.multi_reduction <add>, %1, %cst [1, 2] : vector<1x16x128xf32> to vector<1xf32>
    %3 = vector.shape_cast %2 : vector<1xf32> to vector<1x1x1xf32>
    %4 = vector.extract %3[0, 0, 0] : f32 from vector<1x1x1xf32>
    %cst_1 = arith.constant 2.048000e+03 : f32
    %5 = arith.divf %4, %cst_1 : f32
    %6 = vector.broadcast %5 : f32 to vector<16x128xf32>
    %7 = arith.subf %0, %6 : vector<16x128xf32>
    %c0_2 = arith.constant 0 : index
    %c0_3 = arith.constant 0 : index
    %8 = vector.load %arg1[%c0_2, %c0_3] : memref<16x128xf32, #tpu.memory_space<vmem>>, vector<16x128xf32>
    tpu.vector_store %arg1[%c0_2, %c0_3], %7 {strides = array<i32>} : memref<16x128xf32, #tpu.memory_space<vmem>>, vector<16x128xf32>,
    return
  }
}

</mosaic_0001>

<bundles_post_ra>
// kernel: tpu_custom_call.1
= control target key start
LH: loop header
LB: loop body
LE: loop exit
PB: predicated region body
PF: predicated region fallthrough
CT: control target
= control target key end

     0   :  { %6 = vsyncpa [#allocation3], 0  ;;  %s136_s0 = inlined_call_operand.hbm [shape: f32[16,128], index: 0, kind: input, shape index: {}]   ;;  %s137_s1 = inlined_call_operand.hbm [shape: f32[16,128], index: 1, kind: output, shape index: {}]  }
   0x1   :  { %7 = vsyncpa [#allocation4], 0  ;;  %s110_s6 = smov [#allocation2]  }
   0x2   :  { %s13_s7 = sshll.u32 %s110_s6, 4  ;;  %s14_s7 = int_to_ptr.vmem [resolvable:$true] %s13_s7 }
   0x3   :  { %s74_s8 = scalar_lea.vmem %s14_s7, 256  ;;  %p79_p1 = scmp.lt.s32.totalorder %s14_s7, %s14_s7 }
   0x4   :  { %p75_p0 = scmp.ne.s32.totalorder %s14_s7, %s74_s8  ;;  %p80_p2 = scmp.lt.s32.totalorder %s74_s8, %s74_s8 }
   0x6   :  { %p81_p3 = por %p80_p2, %p79_p1 }
   0x8   :  { %p82_p4 = pnand %p81_p3, %p75_p0 }
   0xa   :  { %85 = shalt.err (!%p82_p4)
}
   0xb   :  { %s111_s9 = smov 128   ;;  %s112_s10 = smov 8  }
   0xc   :  { %19 = dma.hbm_to_vmem [thread:$0]  %s136_s0, 256, %s14_s7, [#allocation3], %s111_s9, %s111_s9, %s112_s10  }
   0xd   :  { %106 = dma.done.wait [#allocation3], 256  }
   0xe   :  { %107 = vsyncadd [#allocation3], 4294967040  ;;  %v23_v0 = vld [vmem:[#allocation2] sm:$0xff]  ;;  %v24_v1 = vld [vmem:[#allocation2 + $0x8] sm:$0xff]  ;;  %s113_s15 = smov [#allocation5]  }
   0xf   :  { %v25_v2 = vadd.f32 %v24_v1, %v23_v0  ;;  %s48_s16 = sshll.u32 %s113_s15, 4  ;;  %s49_s16 = int_to_ptr.vmem [resolvable:$true] %s48_s16 }
  0x10   :  { %s86_s0 = scalar_lea.vmem %s49_s16, 256  ;;  %p91_p6 = scmp.lt.s32.totalorder %s49_s16, %s49_s16 }
  0x11   :  { %26 = vadd.xlane.f32.xlu0 %v25_v2  ;;  %p87_p5 = scmp.ne.s32.totalorder %s49_s16, %s86_s0  ;;  %p92_p7 = scmp.lt.s32.totalorder %s86_s0, %s86_s0 }
  0x13   :  { %p93_p8 = por %p92_p7, %p91_p6 }
  0x15   :  { %p94_p9 = pnand %p93_p8, %p87_p5 }
  0x9a   :  { %v27_v3 = vpop.xlane.xlu0 %26 }
  0x9b   :  { %v28_v4 = vrot.slane %v27_v3, 4 }
  0x9d   :  { %v29_v5 = vadd.f32 %v28_v4, %v27_v3 }
  0x9f   :  { %v30_v6 = vrot.slane %v29_v5, 2 }
  0xa1   :  { %v31_v7 = vadd.f32 %v30_v6, %v29_v5 }
  0xa3   :  { %v32_v8 = vrot.slane %v31_v7, 1 }
  0xa5   :  { %v33_v9 = vadd.f32 %v32_v8, %v31_v7 }
  0xa7   :  { %60 = vpush %v33_v9 }
  0xd8   :  { %s61_s13 = spop %60 }
  0xd9   :  { %s37_s14 = smul.f32 0.00048828125, %s61_s13 }
  0xdb   :  { %v38_v10 = vstv %s37_s14 }
  0xdc   :  { %v39_v11 = vsub.f32 %v23_v0, %v38_v10  ;;  %v40_v12 = vsub.f32 %v24_v1, %v38_v10 }
  0xde   :  { %41 = vst [vmem:[#allocation5] sm:$0xff] %v39_v11  ;;  %42 = vst [vmem:[#allocation5 + $0x8] sm:$0xff] %v40_v12 }
  0xdf   :  { %97 = shalt.err (!%p94_p9)
}
  0xe0   :  { %54 = dma.vmem_to_hbm [thread:$0]  %s49_s16, 256, %s137_s1, [#allocation4], %s111_s9, %s111_s9, %s112_s10  }
  0xe1   :  { %108 = dma.done.wait [#allocation4], 256  }
  0xe2   :  { %109 = vsyncadd [#allocation4], 4294967040 }
  0xe3   :  { %58 = vsyncpa [#allocation3], 1 }
  0xe4   :  { %59 = vsyncpa [#allocation4], 1 }

</bundles_post_ra>
